<compile_context>
chip_gen: v6e
topology: v6e:2x2x1
jax: 0.10.0
libtpu: 0.0.40
codegen_flags: <defaults>
</compile_context>

<pallas_src>
import functools

import jax
import jax.numpy as jnp
import numpy as np
from jax.experimental import pallas as pl
from jax.experimental.pallas import tpu as pltpu


_ONEHOT_MAX_VOCAB = 512     # above this, use the in-kernel row-gather path


def _round_up(x, m):
    return ((x + m - 1) // m) * m


def _vmem_budget_bytes():
    """Per-generation VMEM budget (v5e/v6e: 128 MiB phys, v7x: 64 MiB)."""
    try:
        cap = int(pltpu.get_tpu_info().vmem_capacity_bytes)
    except Exception:
        cap = 64 << 20                        # conservative: v7x per-TC VMEM
    return min(cap * 3 // 4, 100 << 20)


def _tile_vmem_bytes(tb, L, Vpad, E, NFpad, Cpad, use_onehot):
    """Rough per-grid-step footprint of the kernel intermediates."""
    tbl = tb * L
    b = 2 * tb * L * 4                        # ids, double-buffered int32
    if use_onehot:
        b += tbl * Vpad * 2                   # bf16 one-hot
    b += 2 * tbl * E * 4                      # emb + one lazily rolled copy (f32)
    b += tbl * E * 2                          # bf16 tap operand
    b += 3 * tbl * NFpad * 4                  # conv acc + tap contrib + epilogue copy
    b += 2 * tb * Cpad * 4                    # logits, double-buffered f32
    return b


def _pick_batch_tile(B, L, Vpad, E, NFpad, Cpad, use_onehot, tile_budget):
    cands = [t for t in (1024, 512, 256, 128, 64, 32, 16, 8)
             if t <= B and B % t == 0]
    if not cands:
        return B                              # tiny batch: one full-batch tile
    if B >= 16:
        # Keep >= 2 grid steps so the "parallel" batch axis can shard across
        # both v7x TensorCores; ~0.35 us/step overhead is negligible here.
        two_step = [t for t in cands if B // t >= 2]
        if two_step:
            cands = two_step
    for tb in cands:
        if _tile_vmem_bytes(tb, L, Vpad, E, NFpad, Cpad, use_onehot) <= tile_budget:
            return tb
    return cands[-1]


def _textcnn_kernel(use_onehot,
                    ids_ref, table_ref, wconv_ref, bconv_ref, tlim_ref,
                    fcw_ref, fcb_ref, out_ref):
    """Fused embedding gather + multi-size conv + ReLU + max-pool + FC.

    ids_ref   : (TB, L)            int32  token ids (batch tile)
    table_ref : (Vpad, E)          bf16   embedding table (zero-padded rows)
    wconv_ref : (max_k, E, NFpad)  bf16   tap-major conv weights (zero cols for j>=k / pad)
    bconv_ref : (1, NFpad)         f32    conv biases (zero on pad lanes)
    tlim_ref  : (1, NFpad)         int32  valid time length L-k+1 per lane (0 on pad)
    fcw_ref   : (NFpad, Cpad)      bf16   FC weight, zero-padded rows/cols
    fcb_ref   : (1, Cpad)          f32    FC bias (zero-padded)
    out_ref   : (TB, Cpad)         f32    lane-dense logits
    """
    ids = ids_ref[...]
    TB, L = ids.shape
    Vpad = table_ref.shape[0]
    TBL = TB * L
    max_k = wconv_ref.shape[0]

    # ---- Embedding gather -> (TBL, E) f32. ----
    if use_onehot:
        # Tiny-vocab path: one-hot matmul on the MXU; bool -> bf16 directly
        # (no f32 intermediate pass over the largest array in the kernel).
        eq = ids[:, :, None] == jax.lax.broadcasted_iota(
            jnp.int32, (TB, L, Vpad), 2)
        onehot = eq.astype(jnp.bfloat16).reshape(TBL, Vpad)   # L % 8 == 0: layout-free
        emb = jnp.dot(onehot, table_ref[...],
                      preferred_element_type=jnp.float32)     # (TBL, E)
    else:
        # Row gather on the VMEM-resident table; avoids the O(V) one-hot work.
        # TODO(synk): for very large vocabularies keep the table in HBM
        # (memory_space=pl.ANY) and DMA row-gather into VMEM scratch instead.
        emb = jnp.take(table_ref[...], ids.reshape(TBL), axis=0
                       ).astype(jnp.float32)                  # (TBL, E)

    # ---- Conv over all filter sizes, tap-major and lane-dense. ----
    # acc[t, i*F:(i+1)*F] accumulates sum_j emb[t+j] @ W_{k_i}[j]; zero weight
    # columns for j >= k_i keep every tap a full-width (TBL, NFpad) MXU update
    # with no sub-128-lane slicing.  Only ONE lazily rolled copy of the narrow
    # (TBL, E) embedding is live (XLU sublane roll), not max_k full-width
    # rolled copies of the projection.  No explicit zero accumulator: tap 0
    # initializes it.
    e = emb
    acc = jnp.dot(e.astype(jnp.bfloat16), wconv_ref[0],
                  preferred_element_type=jnp.float32)         # (TBL, NFpad)
    for j in range(1, max_k):
        e = pltpu.roll(e, shift=TBL - 1, axis=0)              # e[t] = emb[t + j]
        acc = acc + jnp.dot(e.astype(jnp.bfloat16), wconv_ref[j],
                            preferred_element_type=jnp.float32)

    # ---- Bias + ReLU + time mask + max-pool, lane-dense on (TB, L, NFpad). ----
    # Rows that wrapped through the roll (t >= L-k+1) are masked to 0; ReLU
    # output is >= 0 so the max over time is unaffected.
    acc = jnp.maximum(acc + bconv_ref[...], 0.0)
    acc = acc.reshape(TB, L, acc.shape[-1])                   # split sublane dim only
    t_idx = jax.lax.broadcasted_iota(jnp.int32, acc.shape, 1)
    tlim = tlim_ref[...].reshape(1, 1, acc.shape[-1])
    acc = jnp.where(t_idx < tlim, acc, 0.0)
    pooled = jnp.max(acc, axis=1)                             # (TB, NFpad)

    # ---- FC (dropout is identity at inference).  Zero rows/cols of fcw/fcb
    # keep the padded lanes exactly zero so out[:, :C] is exact.
    out_ref[...] = (jnp.dot(pooled.astype(jnp.bfloat16), fcw_ref[...],
                            preferred_element_type=jnp.float32)
                    + fcb_ref[...])                           # dense (TB, Cpad) store


def textcnn_forward(token_ids, params, filter_sizes):
    B, L = token_ids.shape
    assert L % 8 == 0, "seq length must be a multiple of 8 for layout-free reshapes"
    assert max(filter_sizes) <= L, "filter size must not exceed sequence length"
    V, E = params["embedding"].shape
    F = params[f"conv{filter_sizes[0]}_w"].shape[-1]
    C = params["fc_b"].shape[-1]
    n = len(filter_sizes)
    max_k = max(filter_sizes)
    use_onehot = V <= _ONEHOT_MAX_VOCAB

    # --- Glue-side weight packing (pure layout, done once by XLA). ---
    Vpad = _round_up(V, 16)
    table = jnp.pad(params["embedding"], ((0, Vpad - V), (0, 0))).astype(jnp.bfloat16)

    NF = n * F
    NFpad = _round_up(max(NF, 128), 128)
    Cpad = _round_up(max(C, 128), 128)

    # Tap-major fused conv weights: (max_k, E, NFpad); filter block i of tap j
    # holds W_{k_i}[j] for j < k_i, zeros otherwise (and on the lane pad).
    taps = []
    for j in range(max_k):
        blocks = [params[f"conv{k}_w"][j] if j < k
                  else jnp.zeros((E, F), jnp.float32)
                  for k in filter_sizes]
        wj = jnp.concatenate(blocks, axis=1)                     # (E, NF)
        taps.append(jnp.pad(wj, ((0, 0), (0, NFpad - NF))))
    w_all = jnp.stack(taps, axis=0).astype(jnp.bfloat16)         # (max_k, E, NFpad)

    b_all = jnp.concatenate(
        [params[f"conv{k}_b"].reshape(1, F) for k in filter_sizes], axis=1)
    b_all = jnp.pad(b_all, ((0, 0), (0, NFpad - NF))).astype(jnp.float32)

    # Per-lane valid time length T = L - k + 1 (0 on the lane pad).
    tlim = np.zeros((1, NFpad), np.int32)
    for i, k in enumerate(filter_sizes):
        tlim[0, i * F:(i + 1) * F] = L - k + 1
    tlim = jnp.asarray(tlim)

    # FC weight (PyTorch (C, in)) -> (NFpad, Cpad).  The zero pads (rows for
    # the padded pooled lanes, cols beyond C) make out[:, :C] exact.
    fc_w = jnp.pad(params["fc_w"].T,
                   ((0, NFpad - NF), (0, Cpad - C))).astype(jnp.bfloat16)
    fc_b = jnp.pad(params["fc_b"].reshape(1, C),
                   ((0, 0), (0, Cpad - C))).astype(jnp.float32)

    # --- Generation-aware batch tiling + explicit VMEM budget. ---
    budget = _vmem_budget_bytes()
    weight_bytes = (table.size * 2 + w_all.size * 2 + b_all.size * 4
                    + tlim.size * 4 + fc_w.size * 2 + fc_b.size * 4)
    tile_budget = max(budget - weight_bytes, 4 << 20)
    TB = _pick_batch_tile(B, L, Vpad, E, NFpad, Cpad, use_onehot, tile_budget)
    grid = (B // TB,)

    kernel = functools.partial(_textcnn_kernel, use_onehot)

    # Grid-invariant weights are single-buffered to halve their resident VMEM
    # footprint (matters most on v7x's 64 MiB VMEM).
    def _wspec(shape):
        return pl.BlockSpec(shape, lambda *_: (0,) * len(shape),
                            pipeline_mode=pl.Buffered(1))

    out = pl.pallas_call(
        kernel,
        out_shape=jax.ShapeDtypeStruct((B, Cpad), jnp.float32),
        grid=grid,
        in_specs=[
            pl.BlockSpec((TB, L), lambda i: (i, 0)),          # token ids (batch tile)
            _wspec((Vpad, E)),                                # embedding table
            _wspec((max_k, E, NFpad)),                        # tap-major conv weights
            _wspec((1, NFpad)),                               # conv biases
            _wspec((1, NFpad)),                               # per-lane time limits
            _wspec((NFpad, Cpad)),                            # fc weight
            _wspec((1, Cpad)),                                # fc bias
        ],
        out_specs=pl.BlockSpec((TB, Cpad), lambda i: (i, 0)),
        compiler_params=pltpu.CompilerParams(
            dimension_semantics=("parallel",),                # megacore / v7x 2 TCs
            vmem_limit_bytes=int(budget)),
    )(token_ids.astype(jnp.int32), table, w_all, b_all, tlim, fc_w, fc_b)

    return out[:, :C]


def textcnn_reference(token_ids, params, filter_sizes):
    """Pure-JAX f32 reference matching the PyTorch forward (eval mode)."""
    emb = jnp.take(params["embedding"], token_ids, axis=0)       # (B, L, E)
    L = emb.shape[1]
    pooled = []
    for k in filter_sizes:
        w = params[f"conv{k}_w"]                                 # (k, E, F)
        b = params[f"conv{k}_b"]                                 # (1, F)
        T = L - k + 1
        conv = sum(jnp.einsum("ble,ef->blf", emb[:, j:j + T, :], w[j])
                   for j in range(k))
        conv = jax.nn.relu(conv + b)                             # (B, T, F)
        pooled.append(jnp.max(conv, axis=1))                     # (B, F)
    feat = jnp.concatenate(pooled, axis=-1)
    return feat @ params["fc_w"].T + params["fc_b"]


def init_params(key, n_vocab, embedding_dim, num_filters, filter_sizes, num_classes):
    keys = jax.random.split(key, 2 + 2 * len(filter_sizes) + 2)
    params = {}

    # Embedding (padding_idx = n_vocab - 1 -> zero row, matching nn.Embedding).
    emb = 0.1 * jax.random.normal(keys[0], (n_vocab, embedding_dim), jnp.float32)
    emb = emb.at[n_vocab - 1].set(0.0)
    params["embedding"] = emb

    # Conv weights stored in kernel-friendly layout (k, E, F).
    # NOTE: real PyTorch Conv2d(1, F, (k, E)) weights are (F, 1, k, E); loading
    # them requires w_pt.squeeze(1).transpose -> (k, E, F) in glue.
    for i, k in enumerate(filter_sizes):
        params[f"conv{k}_w"] = 0.1 * jax.random.normal(
            keys[1 + 2 * i], (k, embedding_dim, num_filters), jnp.float32)
        params[f"conv{k}_b"] = 0.1 * jax.random.normal(
            keys[2 + 2 * i], (1, num_filters), jnp.float32)

    in_dim = num_filters * len(filter_sizes)
    params["fc_w"] = 0.1 * jax.random.normal(
        keys[-2], (num_classes, in_dim), jnp.float32)            # PyTorch (out, in)
    params["fc_b"] = 0.1 * jax.random.normal(
        keys[-1], (1, num_classes), jnp.float32)
    return params


if __name__ == "__main__":
    # Small config: is_role=False branch of TextCNN.
    B, L = 2, 16
    n_vocab, embedding_dim = 50, 32
    num_filters = 8
    filter_sizes = [2, 3, 4]
    num_classes = 4

    key = jax.random.PRNGKey(0)
    k_ids, k_params = jax.random.split(key)

    params = init_params(k_params, n_vocab, embedding_dim, num_filters,
                         filter_sizes, num_classes)
    token_ids = jax.random.randint(k_ids, (B, L), 0, n_vocab, dtype=jnp.int32)

    out = textcnn_forward(token_ids, params, filter_sizes)
    out = jax.block_until_ready(out)
    assert out.shape == (B, num_classes), out.shape

    # Sanity check against the pure-JAX f32 reference (bf16 matmuls -> loose tol).
    ref = jax.block_until_ready(textcnn_reference(token_ids, params, filter_sizes))
    max_err = float(jnp.max(jnp.abs(out - ref)))
    assert max_err < 5e-2, f"max abs err {max_err}"

    print("KERNEL_OK")
</pallas_src>

<mosaic_0001>
module attributes {stable_mosaic.version = 11 : i64} {
  func.func @_textcnn_kernel(%arg0: i32, %arg1: memref<2x16xi32, #tpu.memory_space<vmem>>, %arg2: memref<64x32xbf16, #tpu.memory_space<vmem>>, %arg3: memref<4x32x128xbf16, #tpu.memory_space<vmem>>, %arg4: memref<1x128xf32, #tpu.memory_space<vmem>>, %arg5: memref<1x128xi32, #tpu.memory_space<vmem>>, %arg6: memref<128x128xbf16, #tpu.memory_space<vmem>>, %arg7: memref<1x128xf32, #tpu.memory_space<vmem>>, %arg8: memref<2x128xf32, #tpu.memory_space<vmem>>) attributes {dimension_semantics = [#tpu.dimension_semantics<parallel>], iteration_bounds = array<i64: 1>, scalar_prefetch = 0 : i64, scratch_operands = 0 : i64, tpu.core_type = #tpu.core_type<tc>, window_params = [{transform_indices = @transform_0, window_bounds = array<i64: 2, 16>}, {pipeline_mode = #tpu.pipeline_mode<synchronous>, transform_indices = @transform_1, window_bounds = array<i64: 64, 32>}, {pipeline_mode = #tpu.pipeline_mode<synchronous>, transform_indices = @transform_2, window_bounds = array<i64: 4, 32, 128>}, {pipeline_mode = #tpu.pipeline_mode<synchronous>, transform_indices = @transform_3, window_bounds = array<i64: 1, 128>}, {pipeline_mode = #tpu.pipeline_mode<synchronous>, transform_indices = @transform_4, window_bounds = array<i64: 1, 128>}, {pipeline_mode = #tpu.pipeline_mode<synchronous>, transform_indices = @transform_5, window_bounds = array<i64: 128, 128>}, {pipeline_mode = #tpu.pipeline_mode<synchronous>, transform_indices = @transform_6, window_bounds = array<i64: 1, 128>}, {transform_indices = @transform_7, window_bounds = array<i64: 2, 128>}]} {
    %c0 = arith.constant 0 : index
    %c0_0 = arith.constant 0 : index
    %0 = vector.load %arg1[%c0, %c0_0] : memref<2x16xi32, #tpu.memory_space<vmem>>, vector<2x16xi32>
    %1 = vector.shape_cast %0 : vector<2x16xi32> to vector<2x16x1xi32>
    %2 = tpu.iota {dimensions = array<i32: 2>} : vector<2x16x64xi32>
    %3 = vector.broadcast %1 : vector<2x16x1xi32> to vector<2x16x64xi32>
    %4 = arith.cmpi eq, %3, %2 : vector<2x16x64xi32>
    %5 = arith.extui %4 : vector<2x16x64xi1> to vector<2x16x64xi32>
    %6 = arith.sitofp %5 : vector<2x16x64xi32> to vector<2x16x64xf32>
    %7 = arith.truncf %6 : vector<2x16x64xf32> to vector<2x16x64xbf16>
    %8 = vector.shape_cast %7 : vector<2x16x64xbf16> to vector<32x64xbf16>
    %c0_1 = arith.constant 0 : index
    %c0_2 = arith.constant 0 : index
    %9 = vector.load %arg2[%c0_1, %c0_2] : memref<64x32xbf16, #tpu.memory_space<vmem>>, vector<64x32xbf16>
    %cst = arith.constant dense<0.000000e+00> : vector<32x32xf32>
    %10 = tpu.matmul %8, %9, %cst {dimension_numbers = #tpu.dot_dimension_numbers<[1], [0], [0], [1], [0, 0, 1, 1], [], []>} : vector<32x64xbf16>, vector<64x32xbf16>, vector<32x32xf32> -> vector<32x32xf32>
    %11 = arith.truncf %10 : vector<32x32xf32> to vector<32x32xbf16>
    %c0_3 = arith.constant 0 : index
    %c0_4 = arith.constant 0 : index
    %c0_5 = arith.constant 0 : index
    %12 = vector.load %arg3[%c0_3, %c0_4, %c0_5] : memref<4x32x128xbf16, #tpu.memory_space<vmem>>, vector<1x32x128xbf16>
    %13 = vector.shape_cast %12 : vector<1x32x128xbf16> to vector<32x128xbf16>
    %cst_6 = arith.constant dense<0.000000e+00> : vector<32x128xf32>
    %14 = tpu.matmul %11, %13, %cst_6 {dimension_numbers = #tpu.dot_dimension_numbers<[1], [0], [0], [1], [0, 0, 1, 1], [], []>} : vector<32x32xbf16>, vector<32x128xbf16>, vector<32x128xf32> -> vector<32x128xf32>
    %c31_i32 = arith.constant 31 : i32
    %15 = tpu.dynamic_rotate %10 by %c31_i32 dim 0 : vector<32x32xf32>, i32 -> vector<32x32xf32>
    %16 = arith.truncf %15 : vector<32x32xf32> to vector<32x32xbf16>
    %c1 = arith.constant 1 : index
    %c0_7 = arith.constant 0 : index
    %c0_8 = arith.constant 0 : index
    %17 = vector.load %arg3[%c1, %c0_7, %c0_8] : memref<4x32x128xbf16, #tpu.memory_space<vmem>>, vector<1x32x128xbf16>
    %18 = vector.shape_cast %17 : vector<1x32x128xbf16> to vector<32x128xbf16>
    %cst_9 = arith.constant dense<0.000000e+00> : vector<32x128xf32>
    %19 = tpu.matmul %16, %18, %cst_9 {dimension_numbers = #tpu.dot_dimension_numbers<[1], [0], [0], [1], [0, 0, 1, 1], [], []>} : vector<32x32xbf16>, vector<32x128xbf16>, vector<32x128xf32> -> vector<32x128xf32>
    %20 = arith.addf %14, %19 : vector<32x128xf32>
    %c31_i32_10 = arith.constant 31 : i32
    %21 = tpu.dynamic_rotate %15 by %c31_i32_10 dim 0 : vector<32x32xf32>, i32 -> vector<32x32xf32>
    %22 = arith.truncf %21 : vector<32x32xf32> to vector<32x32xbf16>
    %c2 = arith.constant 2 : index
    %c0_11 = arith.constant 0 : index
    %c0_12 = arith.constant 0 : index
    %23 = vector.load %arg3[%c2, %c0_11, %c0_12] : memref<4x32x128xbf16, #tpu.memory_space<vmem>>, vector<1x32x128xbf16>
    %24 = vector.shape_cast %23 : vector<1x32x128xbf16> to vector<32x128xbf16>
    %cst_13 = arith.constant dense<0.000000e+00> : vector<32x128xf32>
    %25 = tpu.matmul %22, %24, %cst_13 {dimension_numbers = #tpu.dot_dimension_numbers<[1], [0], [0], [1], [0, 0, 1, 1], [], []>} : vector<32x32xbf16>, vector<32x128xbf16>, vector<32x128xf32> -> vector<32x128xf32>
    %26 = arith.addf %20, %25 : vector<32x128xf32>
    %c31_i32_14 = arith.constant 31 : i32
    %27 = tpu.dynamic_rotate %21 by %c31_i32_14 dim 0 : vector<32x32xf32>, i32 -> vector<32x32xf32>
    %28 = arith.truncf %27 : vector<32x32xf32> to vector<32x32xbf16>
    %c3 = arith.constant 3 : index
    %c0_15 = arith.constant 0 : index
    %c0_16 = arith.constant 0 : index
    %29 = vector.load %arg3[%c3, %c0_15, %c0_16] : memref<4x32x128xbf16, #tpu.memory_space<vmem>>, vector<1x32x128xbf16>
    %30 = vector.shape_cast %29 : vector<1x32x128xbf16> to vector<32x128xbf16>
    %cst_17 = arith.constant dense<0.000000e+00> : vector<32x128xf32>
    %31 = tpu.matmul %28, %30, %cst_17 {dimension_numbers = #tpu.dot_dimension_numbers<[1], [0], [0], [1], [0, 0, 1, 1], [], []>} : vector<32x32xbf16>, vector<32x128xbf16>, vector<32x128xf32> -> vector<32x128xf32>
    %32 = arith.addf %26, %31 : vector<32x128xf32>
    %c0_18 = arith.constant 0 : index
    %c0_19 = arith.constant 0 : index
    %33 = vector.load %arg4[%c0_18, %c0_19] : memref<1x128xf32, #tpu.memory_space<vmem>>, vector<1x128xf32>
    %34 = vector.broadcast %33 : vector<1x128xf32> to vector<32x128xf32>
    %35 = arith.addf %32, %34 : vector<32x128xf32>
    %cst_20 = arith.constant 0.000000e+00 : f32
    %36 = vector.broadcast %cst_20 : f32 to vector<32x128xf32>
    %37 = arith.maximumf %35, %36 : vector<32x128xf32>
    %38 = vector.shape_cast %37 : vector<32x128xf32> to vector<2x16x128xf32>
    %39 = tpu.iota {dimensions = array<i32: 1>} : vector<2x16x128xi32>
    %c0_21 = arith.constant 0 : index
    %c0_22 = arith.constant 0 : index
    %40 = vector.load %arg5[%c0_21, %c0_22] : memref<1x128xi32, #tpu.memory_space<vmem>>, vector<1x128xi32>
    %41 = vector.shape_cast %40 : vector<1x128xi32> to vector<1x1x128xi32>
    %42 = vector.broadcast %41 : vector<1x1x128xi32> to vector<2x16x128xi32>
    %43 = arith.cmpi slt, %39, %42 : vector<2x16x128xi32>
    %cst_23 = arith.constant 0.000000e+00 : f32
    %44 = vector.broadcast %cst_23 : f32 to vector<2x16x128xf32>
    %45 = arith.select %43, %38, %44 : vector<2x16x128xi1>, vector<2x16x128xf32>
    %cst_24 = arith.constant dense<0xFF800000> : vector<2x128xf32>
    %46 = vector.multi_reduction <maximumf>, %45, %cst_24 [1] : vector<2x16x128xf32> to vector<2x128xf32>
    %47 = arith.truncf %46 : vector<2x128xf32> to vector<2x128xbf16>
    %c0_25 = arith.constant 0 : index
    %c0_26 = arith.constant 0 : index
    %48 = vector.load %arg6[%c0_25, %c0_26] : memref<128x128xbf16, #tpu.memory_space<vmem>>, vector<128x128xbf16>
    %cst_27 = arith.constant dense<0.000000e+00> : vector<2x128xf32>
    %49 = tpu.matmul %47, %48, %cst_27 {dimension_numbers = #tpu.dot_dimension_numbers<[1], [0], [0], [1], [0, 0, 1, 1], [], []>} : vector<2x128xbf16>, vector<128x128xbf16>, vector<2x128xf32> -> vector<2x128xf32>
    %c0_28 = arith.constant 0 : index
    %c0_29 = arith.constant 0 : index
    %50 = vector.load %arg7[%c0_28, %c0_29] : memref<1x128xf32, #tpu.memory_space<vmem>>, vector<1x128xf32>
    %51 = vector.broadcast %50 : vector<1x128xf32> to vector<2x128xf32>
    %52 = arith.addf %49, %51 : vector<2x128xf32>
    %c0_30 = arith.constant 0 : index
    %c0_31 = arith.constant 0 : index
    %53 = vector.load %arg8[%c0_30, %c0_31] : memref<2x128xf32, #tpu.memory_space<vmem>>, vector<2x128xf32>
    tpu.vector_store %arg8[%c0_30, %c0_31], %52 {strides = array<i32>} : memref<2x128xf32, #tpu.memory_space<vmem>>, vector<2x128xf32>,
    return
  }
  func.func @transform_0(%arg0: i32) -> (i32, i32) {
    %c0_i32 = arith.constant 0 : i32
    %c0_i32_0 = arith.constant 0 : i32
    return %arg0, %c0_i32 : i32, i32
  }
  func.func @transform_1(%arg0: i32) -> (i32, i32) {
    %c0_i32 = arith.constant 0 : i32
    %c0_i32_0 = arith.constant 0 : i32
    %c0_i32_1 = arith.constant 0 : i32
    return %c0_i32, %c0_i32_0 : i32, i32
  }
  func.func @transform_2(%arg0: i32) -> (i32, i32, i32) {
    %c0_i32 = arith.constant 0 : i32
    %c0_i32_0 = arith.constant 0 : i32
    %c0_i32_1 = arith.constant 0 : i32
    %c0_i32_2 = arith.constant 0 : i32
    return %c0_i32, %c0_i32_0, %c0_i32_1 : i32, i32, i32
  }
  func.func @transform_3(%arg0: i32) -> (i32, i32) {
    %c0_i32 = arith.constant 0 : i32
    %c0_i32_0 = arith.constant 0 : i32
    %c0_i32_1 = arith.constant 0 : i32
    return %c0_i32, %c0_i32_0 : i32, i32
  }
  func.func @transform_4(%arg0: i32) -> (i32, i32) {
    %c0_i32 = arith.constant 0 : i32
    %c0_i32_0 = arith.constant 0 : i32
    %c0_i32_1 = arith.constant 0 : i32
    return %c0_i32, %c0_i32_0 : i32, i32
  }
  func.func @transform_5(%arg0: i32) -> (i32, i32) {
    %c0_i32 = arith.constant 0 : i32
    %c0_i32_0 = arith.constant 0 : i32
    %c0_i32_1 = arith.constant 0 : i32
    return %c0_i32, %c0_i32_0 : i32, i32
  }
  func.func @transform_6(%arg0: i32) -> (i32, i32) {
    %c0_i32 = arith.constant 0 : i32
    %c0_i32_0 = arith.constant 0 : i32
    %c0_i32_1 = arith.constant 0 : i32
    return %c0_i32, %c0_i32_0 : i32, i32
  }
  func.func @transform_7(%arg0: i32) -> (i32, i32) {
    %c0_i32 = arith.constant 0 : i32
    %c0_i32_0 = arith.constant 0 : i32
    return %arg0, %c0_i32 : i32, i32
  }
}

</mosaic_0001>

<bundles_post_ra>
// kernel: tpu_custom_call.1
= control target key start
LH: loop header
LB: loop body
LE: loop exit
PB: predicated region body
PF: predicated region fallthrough
CT: control target
= control target key end

     0   :  { %12 = vsyncpa [#allocation3], 0  ;;  %s1050_s0 = inlined_call_operand.vmem [shape: s32[2,16], index: 0, kind: input, shape index: {}]   ;;  %s1051_s1 = inlined_call_operand.vmem [shape: bf16[64,32], index: 1, kind: input, shape index: {}]   ;;  %s1052_s2 = inlined_call_operand.hbm [shape: bf16[4,32,128], index: 2, kind: input, shape index: {}]   ;;  %s1053_s3 = inlined_call_operand.vmem [shape: f32[1,128], index: 3, kind: input, shape index: {}]   ;;  %s1054_s4 = inlined_call_operand.vmem [shape: s32[1,128], index: 4, kind: input, shape index: {}]   ;;  %s1055_s5 = inlined_call_operand.hbm [shape: bf16[128,128], index: 5, kind: input, shape index: {}]   ;;  %s1056_s6 = inlined_call_operand.vmem [shape: f32[1,128], index: 6, kind: input, shape index: {}]   ;;  %s1057_s7 = inlined_call_operand.hbm [shape: f32[2,128], index: 7, kind: output, shape index: {}]  }
   0x1   :  { %13 = vsyncpa [#allocation6], 0 }
   0x2   :  { %14 = vsyncpa [#allocation4], 0  ;;  %s918_s24 = smov [#allocation2]  }
   0x3   :  { %s24_s25 = sshll.u32 %s918_s24, 4  ;;  %s25_s25 = int_to_ptr.vmem [resolvable:$true] %s24_s25 }
   0x4   :  { %s860_s26 = scalar_lea.vmem %s25_s25, 1024  ;;  %p865_p1 = scmp.lt.s32.totalorder %s25_s25, %s25_s25 }
   0x5   :  { %p861_p0 = scmp.ne.s32.totalorder %s25_s25, %s860_s26  ;;  %p866_p2 = scmp.lt.s32.totalorder %s860_s26, %s860_s26 }
   0x7   :  { %p867_p3 = por %p866_p2, %p865_p1 }
   0x9   :  { %p868_p4 = pnand %p867_p3, %p861_p0 }
   0xb   :  { %871 = shalt.err (!%p868_p4)
}
   0xc   :  { %s919_s27 = smov 64   ;;  %s920_s28 = smov 4  }
   0xd   :  { %30 = dma.hbm_to_vmem [thread:$0]  %s1052_s2, 1024, %s25_s25, [#allocation3], %s919_s27, %s919_s27, %s920_s28  }
   0xe   :  { %s921_s8 = smov [#allocation5]  }
   0xf   :  { %s40_s9 = sshll.u32 %s921_s8, 4  ;;  %s41_s9 = int_to_ptr.vmem [resolvable:$true] %s40_s9 }
  0x10   :  { %s880_s10 = scalar_lea.vmem %s41_s9, 1024  ;;  %p885_p6 = scmp.lt.s32.totalorder %s41_s9, %s41_s9 }
  0x11   :  { %p881_p5 = scmp.ne.s32.totalorder %s41_s9, %s880_s10  ;;  %p886_p7 = scmp.lt.s32.totalorder %s880_s10, %s880_s10 }
  0x13   :  { %p887_p8 = por %p886_p7, %p885_p6 }
  0x15   :  { %p888_p9 = pnand %p887_p8, %p881_p5 }
  0x17   :  { %891 = shalt.err (!%p888_p9)
}
  0x18   :  { %46 = dma.hbm_to_vmem [thread:$0]  %s1055_s5, 1024, %s41_s9, [#allocation6], %s919_s27, %s919_s27, %s920_s28  }
  0x19   :  { %912 = dma.done.wait [#allocation3], 1024  }
  0x1a   :  { %913 = vsyncadd [#allocation3], 4294966272 }
  0x1b   :  { %914 = dma.done.wait [#allocation6], 1024  }
  0x1c   :  { %915 = vsyncadd [#allocation6], 4294966272  ;;  %v57_v0 = vlaneseq  ;;  %v56_v4 = vld [vmem:[%s1050_s0] sm:$0x3]  ;;  %v832_v7 = vld [vmem:[%s1051_s1 + $0x18] sm:$0xff]   ;;  %vm127_vm4 = vcmask 523264  }
  0x1d   :  { %v833_v8 = vld [vmem:[%s1051_s1 + $0x10] sm:$0xff]   ;;  %761 = vmatprep.subr.bf16.mxu1 %v832_v7  ;;  %v834_v9 = vld [vmem:[%s1051_s1 + $0x8] sm:$0xff]   ;;  %v835_v10 = vld [vmem:[%s1051_s1] sm:$0xff]   ;;  %v922_v16 = vmov 0.0   ;;  %vm219_vm6 = vcmask 261120   ;;  %vm923_vm7 = vmmov 0  }
  0x1e   :  { %v971_v1 = vshrl.u32 %v57_v0, 7  ;;  %762 = vmatpush3.bf16.msra.mxu1 %v832_v7  ;;  %v80_v11 = vand.u32 127, %v57_v0  ;;  %v836_v23 = vld [vmem:[#allocation2 + $0x18] sm:$0xff]   ;;  %v838_v24 = vld [vmem:[#allocation2 + $0x28] sm:$0xff]   ;;  %v837_v25 = vld [vmem:[#allocation2 + $0x10] sm:$0xff]   ;;  %vm584_vm10 = vcmask 1041409  }
  0x1f   :  { %763 = vmatprep.subr.bf16.mxu1 %v833_v8  ;;  %789 = vmatprep.subr.bf16.mxu0 %v838_v24  ;;  %v840_v26 = vld [vmem:[#allocation2 + $0x20] sm:$0xff]   ;;  %v839_v27 = vld [vmem:[#allocation2 + $0x8] sm:$0xff]   ;;  %v842_v57 = vld [vmem:[#allocation2 + $0x38] sm:$0xff]   ;;  %s924_s23 = smov [#allocation7]  }
  0x20   :  { %v70_v2 = vsub.s32 1, %v971_v1  ;;  %v59_v3 = vsub.s32 0, %v971_v1  ;;  %790 = vmatpush3.bf16.msra.mxu0 %v838_v24  ;;  %vm195_vm5 = vcmp.lt.s32.totalorder %v971_v1, 7  ;;  %v841_v51 = vld [vmem:[#allocation2] sm:$0xff]   ;;  %v843_v61 = vld [vmem:[#allocation2 + $0x30] sm:$0xff]   ;;  %s683_s24 = sshll.u32 %s924_s23, 4  ;;  %s684_s24 = int_to_ptr.vmem [resolvable:$true] %s683_s24 }
  0x21   :  { %791 = vmatprep.subr.bf16.mxu0 %v840_v26  ;;  %v847_v7 = vld [vmem:[#allocation5 + $0x20] sm:$0xff]   ;;  %s892_s25 = scalar_lea.vmem %s684_s24, 32  ;;  %p897_p11 = scmp.lt.s32.totalorder %s684_s24, %s684_s24 }
  0x22   :  { %v71_v5 = vrot.slane %v56_v4, %v70_v2  ;;  %v60_v6 = vrot.slane %v56_v4, %v59_v3  ;;  %764 = vmatpush3.bf16.msra.mxu1 %v833_v8  ;;  %v844_v4 = vld [vmem:[#allocation5 + $0x38] sm:$0xff]   ;;  %p893_p10 = scmp.ne.s32.totalorder %s684_s24, %s892_s25  ;;  %p898_p12 = scmp.lt.s32.totalorder %s892_s25, %s892_s25 }
  0x23   :  { %765 = vmatprep.subr.bf16.mxu1 %v834_v9  ;;  %v848_v8 = vld [vmem:[#allocation5 + $0x18] sm:$0xff]  }
  0x24   :  { %73 = vbcast.lane.b32.xlu1 %v71_v5, 256  ;;  %62 = vbcast.lane.b32.xlu0 %v60_v6, 256  ;;  %p899_p13 = por %p898_p12, %p897_p11 }
  0x25   :  { %792 = vmatpush3.bf16.msra.mxu0 %v840_v26 }
  0x26   :  { %766 = vmatpush3.bf16.msra.mxu1 %v834_v9  ;;  %805 = vmatprep.subr.bf16.mxu0 %v922_v16  ;;  %v849_v9 = vld [vmem:[#allocation5 + $0x10] sm:$0xff]   ;;  %p900_p0 = pnand %p899_p13, %p893_p10 }
  0x27   :  { %767 = vmatprep.subr.bf16.mxu1 %v835_v10 }
  0x28   :  { %77 = vbcast.lane.b32.xlu1 %v71_v5, 264  ;;  %66 = vbcast.lane.b32.xlu0 %v60_v6, 264  ;;  %v845_v5 = vld [vmem:[#allocation5 + $0x30] sm:$0xff]   ;;  %v846_v6 = vld [vmem:[#allocation5 + $0x28] sm:$0xff]  }
  0x2a   :  { %768 = vmatpush3.bf16.msra.mxu1 %v835_v10  ;;  %v850_v10 = vld [vmem:[#allocation5 + $0x8] sm:$0xff]  }
  0x2b   :  { %773 = vmatprep.subr.bf16.mxu1 %v836_v23 }
  0x96   :  { %v74_v12 = vpop.permute.xlu1 %73  ;;  %v63_v13 = vpop.permute.xlu0 %62 }
  0x97   :  { %vm83_vm0 = vcmp.eq.s32.totalorder %v74_v12, %v80_v11  ;;  %vm81_vm1 = vcmp.eq.s32.totalorder %v63_v13, %v80_v11 }
  0x98   :  { %v695_v17 = vsel %vm83_vm0, 1.0, %v922_v16  ;;  %v693_v18 = vsel %vm81_vm1, 1.0, %v922_v16 }
  0x9a   :  { %v78_v14 = vpop.permute.xlu1 %77  ;;  %v67_v15 = vpop.permute.xlu0 %66 }
  0x9b   :  { %vm84_vm2 = vcmp.eq.s32.totalorder %v78_v14, %v80_v11  ;;  %vm82_vm3 = vcmp.eq.s32.totalorder %v67_v15, %v80_v11  ;;  %v851_v11 = vld [vmem:[#allocation5] sm:$0xff]  }
  0x9c   :  { %v696_v19 = vsel %vm84_vm2, 1.0, %v922_v16  ;;  %v694_v20 = vsel %vm82_vm3, 1.0, %v922_v16 }
  0x9d   :  { %v94_v21 = vpack.c.bf16 %v696_v19, %v695_v17  ;;  %v93_v22 = vpack.c.bf16 %v694_v20, %v693_v18 }
  0x9f   :  { %769 = vmatprep.mubr.msk.bf16.mxu1 %vm127_vm4, %v93_v22 }
  0xa0   :  { %770 = vmatmul.mubr.msk.bf16.vlgmr.msra.gmra.mxu1 %vm127_vm4, %v94_v21 }
  0xa1   :  { %774 = vmatpush3.bf16.msra.mxu1 %v836_v23 }
  0xa2   :  { %775 = vmatprep.subr.bf16.mxu1 %v837_v25 }
  0xa5   :  { %776 = vmatpush3.bf16.msra.mxu1 %v837_v25 }
  0xa6   :  { %781 = vmatprep.subr.bf16.mxu1 %v839_v27 }
 0x160   :  { %v771_v28 = vpop.f32.mrf.mxu1 }
 0x161   :  { %v191_v31 = vrot.slane %v771_v28, 1 }
 0x162   :  { %v168_v29 = vpop.f32.mrf.mxu1 }
 0x163   :  { %v189_v32 = vrot.slane %v168_v29, 1 }
 0x164   :  { %v772_v30 = vpop.f32.mrf.mxu1 }
 0x165   :  { %v192_v33 = vrot.slane %v772_v30, 1  ;;  %v184_v60 = vpack.c.bf16 %v772_v30, %v771_v28 }
 0x166   :  { %v171_v34 = vpop.f32.mrf.mxu1 }
 0x167   :  { %v196_v35 = vsel %vm195_vm5, %v191_v31, %v192_v33  ;;  %v199_v36 = vsel %vm195_vm5, %v192_v33, %v189_v32  ;;  %v190_v37 = vrot.slane %v171_v34, 1  ;;  %v183_v46 = vpack.c.bf16 %v171_v34, %v168_v29 }
 0x168   :  { %v345_v38 = vrot.slane %v199_v36, 1  ;;  %v344_v39 = vrot.slane %v196_v35, 1  ;;  %v201_v45 = vpack.c.bf16 %v199_v36, %v196_v35 }
 0x169   :  { %v197_v40 = vsel %vm195_vm5, %v190_v37, %v191_v31  ;;  %v198_v41 = vsel %vm195_vm5, %v189_v32, %v190_v37 }
 0x16a   :  { %v200_v42 = vpack.c.bf16 %v197_v40, %v198_v41  ;;  %v342_v43 = vrot.slane %v198_v41, 1  ;;  %v343_v44 = vrot.slane %v197_v40, 1  ;;  %v346_v47 = vsel %vm195_vm5, %v344_v39, %v345_v38 }
 0x16b   :  { %v430_v56 = vrot.slane %v346_v47, 1 }
 0x16c   :  { %777 = vmatprep.mubr.msk.bf16.mxu1 %vm219_vm6, %v200_v42  ;;  %v347_v48 = vsel %vm195_vm5, %v343_v44, %v344_v39  ;;  %v348_v49 = vsel %vm195_vm5, %v342_v43, %v343_v44  ;;  %v349_v50 = vsel %vm195_vm5, %v345_v38, %v342_v43  ;;  %v529_v38 = vadd.s32 8, %v971_v1  ;;  %v720_v39 = vld [vmem:[%s1054_s4] ss:$0 sm:$0xff] }
 0x16d   :  { %778 = vmatmul.mubr.msk.bf16.vlgmr.msra.gmra.mxu1 %vm219_vm6, %v201_v45  ;;  %v350_v52 = vpack.c.bf16 %v347_v48, %v348_v49  ;;  %v428_v53 = vrot.slane %v348_v49, 1  ;;  %v429_v54 = vrot.slane %v347_v48, 1  ;;  %v351_v55 = vpack.c.bf16 %v349_v50, %v346_v47 }
 0x16e   :  { %782 = vmatpush3.bf16.msra.mxu1 %v839_v27  ;;  %785 = vmatprep.mubr.msk.bf16.mxu1 %vm219_vm6, %v183_v46  ;;  %v431_v62 = vrot.slane %v349_v50, 1  ;;  %vm535_vm8 = vcmp.lt.s32.totalorder %v971_v1, %v720_v39  ;;  %vm536_vm9 = vcmp.lt.s32.totalorder %v529_v38, %v720_v39 }
 0x16f   :  { %793 = vmatprep.mubr.msk.bf16.mxu0 %vm219_vm6, %v350_v52  ;;  %783 = vmatprep.subr.bf16.mxu1 %v841_v51  ;;  %v433_v58 = vsel %vm195_vm5, %v429_v54, %v430_v56  ;;  %v434_v59 = vsel %vm195_vm5, %v428_v53, %v429_v54 }
 0x170   :  { %794 = vmatmul.mubr.msk.bf16.vlgmr.msra.gmra.mxu0 %vm219_vm6, %v351_v55  ;;  %v436_v63 = vpack.c.bf16 %v433_v58, %v434_v59  ;;  %v432_v0 = vsel %vm195_vm5, %v430_v56, %v431_v62  ;;  %v435_v2 = vsel %vm195_vm5, %v431_v62, %v428_v53 }
 0x171   :  { %v437_v3 = vpack.c.bf16 %v435_v2, %v432_v0  ;;  %806 = vmatpush3.bf16.msra.mxu0 %v844_v4  ;;  %821 = vmatprep.mubr.msk.bf16.mxu0 %vm923_vm7, %v922_v16 }
 0x172   :  { %784 = vmatpush3.bf16.msra.mxu1 %v841_v51  ;;  %807 = vmatprep.subr.bf16.mxu0 %v922_v16 }
 0x173   :  { %797 = vmatprep.subr.bf16.mxu1 %v842_v57 }
 0x175   :  { %786 = vmatmul.mubr.msk.bf16.vlgmr.msra.gmra.mxu1 %vm219_vm6, %v184_v60  ;;  %808 = vmatpush3.bf16.msra.mxu0 %v845_v5 }
 0x176   :  { %798 = vmatpush3.bf16.msra.mxu1 %v842_v57  ;;  %801 = vmatprep.mubr.msk.bf16.mxu1 %vm219_vm6, %v436_v63 }
 0x177   :  { %799 = vmatprep.subr.bf16.mxu1 %v843_v61  ;;  %809 = vmatprep.subr.bf16.mxu0 %v922_v16 }
 0x179   :  { %810 = vmatpush3.bf16.msra.mxu0 %v846_v6 }
 0x17a   :  { %800 = vmatpush3.bf16.msra.mxu1 %v843_v61  ;;  %811 = vmatprep.subr.bf16.mxu0 %v922_v16 }
 0x17d   :  { %802 = vmatmul.mubr.msk.bf16.vlgmr.msra.gmra.mxu1 %vm219_vm6, %v437_v3  ;;  %812 = vmatpush3.bf16.msra.mxu0 %v847_v7 }
 0x17e   :  { %813 = vmatprep.subr.bf16.mxu0 %v922_v16 }
 0x181   :  { %814 = vmatpush3.bf16.msra.mxu0 %v848_v8 }
 0x182   :  { %815 = vmatprep.subr.bf16.mxu0 %v922_v16 }
 0x185   :  { %816 = vmatpush3.bf16.msra.mxu0 %v849_v9 }
 0x186   :  { %817 = vmatprep.subr.bf16.mxu0 %v922_v16 }
 0x189   :  { %818 = vmatpush3.bf16.msra.mxu0 %v850_v10 }
 0x18a   :  { %819 = vmatprep.subr.bf16.mxu0 %v922_v16  ;;  %v719_v16 = vld [vmem:[%s1053_s3] ss:$0 sm:$0xff] }
 0x18d   :  { %820 = vmatpush3.bf16.msra.mxu0 %v851_v11  ;;  %v721_v11 = vld [vmem:[%s1056_s6] ss:$0 sm:$0xff] }
 0x22d   :  { %v779_v12 = vpop.f32.mrf.mxu1 }
 0x22f   :  { %v260_v13 = vpop.f32.mrf.mxu1 }
 0x230   :  { %v795_v17 = vpop.f32.mrf.mxu0 }
 0x231   :  { %v780_v14 = vpop.f32.mrf.mxu1 }
 0x232   :  { %v409_v21 = vpop.f32.mrf.mxu0 }
 0x233   :  { %v263_v15 = vpop.f32.mrf.mxu1 }
 0x234   :  { %v796_v27 = vpop.f32.mrf.mxu0 }
 0x235   :  { %v787_v18 = vpop.f32.mrf.mxu1 }
 0x236   :  { %v336_v20 = vadd.f32 %v787_v18, %v779_v12  ;;  %v412_v36 = vpop.f32.mrf.mxu0 }
 0x237   :  { %v327_v19 = vpop.f32.mrf.mxu1 }
 0x238   :  { %v328_v23 = vadd.f32 %v327_v19, %v260_v13  ;;  %v426_v26 = vadd.f32 %v795_v17, %v336_v20 }
 0x239   :  { %v788_v22 = vpop.f32.mrf.mxu1 }
 0x23a   :  { %v339_v25 = vadd.f32 %v788_v22, %v780_v14  ;;  %v424_v31 = vadd.f32 %v409_v21, %v328_v23 }
 0x23b   :  { %v330_v24 = vpop.f32.mrf.mxu1 }
 0x23c   :  { %v331_v29 = vadd.f32 %v330_v24, %v263_v15  ;;  %v427_v35 = vadd.f32 %v796_v27, %v339_v25 }
 0x23d   :  { %v803_v28 = vpop.f32.mrf.mxu1 }
 0x23e   :  { %v512_v30 = vadd.f32 %v803_v28, %v426_v26  ;;  %v425_v42 = vadd.f32 %v412_v36, %v331_v29 }
 0x23f   :  { %v495_v32 = vpop.f32.mrf.mxu1 }
 0x240   :  { %v523_v33 = vadd.f32 %v719_v16, %v512_v30  ;;  %v510_v34 = vadd.f32 %v495_v32, %v424_v31 }
 0x241   :  { %v804_v37 = vpop.f32.mrf.mxu1 }
 0x242   :  { %v521_v40 = vadd.f32 %v719_v16, %v510_v34  ;;  %v513_v41 = vadd.f32 %v804_v37, %v427_v35  ;;  %v527_v44 = vmax.f32 %v523_v33, 0.0 }
 0x243   :  { %v498_v43 = vpop.f32.mrf.mxu1 }
 0x244   :  { %v524_v45 = vadd.f32 %v719_v16, %v513_v41  ;;  %v511_v46 = vadd.f32 %v498_v43, %v425_v42  ;;  %v525_v47 = vmax.f32 %v521_v40, 0.0  ;;  %v539_v50 = vsel %vm535_vm8, %v527_v44, 0.0 }
 0x246   :  { %v528_v48 = vmax.f32 %v524_v45, 0.0  ;;  %v522_v49 = vadd.f32 %v719_v16, %v511_v46  ;;  %v537_v54 = vsel %vm535_vm8, %v525_v47, 0.0 }
 0x248   :  { %v540_v51 = vsel %vm536_vm9, %v528_v48, 0.0  ;;  %v526_v52 = vmax.f32 %v522_v49, 0.0 }
 0x249   :  { %v548_v53 = vmax.f32 %v539_v50, %v540_v51 }
 0x24a   :  { %v538_v55 = vsel %vm536_vm9, %v526_v52, 0.0 }
 0x24b   :  { %v549_v56 = vrot.slane %v548_v53, 4  ;;  %v541_v57 = vmax.f32 %v537_v54, %v538_v55 }
 0x24d   :  { %v550_v58 = vmax.f32 %v548_v53, %v549_v56  ;;  %v542_v59 = vrot.slane %v541_v57, 4 }
 0x24f   :  { %v551_v60 = vrot.slane %v550_v58, 2  ;;  %v543_v61 = vmax.f32 %v541_v57, %v542_v59 }
 0x251   :  { %v552_v62 = vmax.f32 %v550_v58, %v551_v60  ;;  %v544_v63 = vrot.slane %v543_v61, 2 }
 0x253   :  { %v553_v0 = vrot.slane %v552_v62, 1  ;;  %v545_v1 = vmax.f32 %v543_v61, %v544_v63 }
 0x255   :  { %v554_v2 = vmax.f32 %v552_v62, %v553_v0  ;;  %v546_v3 = vrot.slane %v545_v1, 1 }
 0x257   :  { %v556_v4 = vpack.c.bf16 %v554_v2, %v554_v2  ;;  %v547_v5 = vmax.f32 %v545_v1, %v546_v3 }
 0x259   :  { %v555_v6 = vpack.c.bf16 %v547_v5, %v547_v5  ;;  %v583_v8 = vunpack.c.l.b16 %v556_v4 }
 0x25b   :  { %v582_v7 = vunpack.c.l.b16 %v555_v6 }
 0x25d   :  { %v585_v9 = vsel %vm584_vm10, %v583_v8, %v582_v7 }
 0x25e   :  { %v586_v10 = vpack.c.b16 %v585_v9, %v585_v9 }
 0x260   :  { %822 = vmatmul.mubr.bf16.vlgmr.msra.gmra.mxu0 %v586_v10 }
 0x320   :  { %v670_v12 = vpop.f32.mrf.mxu0 }
 0x321   :  { %v671_v13 = vadd.f32 %v721_v11, %v670_v12 }
 0x322   :  { %v823_v14 = vpop.f32.mrf.mxu0 }
 0x323   :  { %676 = vst [vmem:[#allocation7] sm:$0x3] %v671_v13 }
 0x324   :  { %v673_v15 = vpop.f32.mrf.mxu0 }
 0x325   :  { %903 = shalt.err (!%p900_p0)
}
 0x326   :  { %686 = dma.vmem_to_hbm [thread:$0]  %s684_s24, 32, %s1057_s7, [#allocation4]   ;;  %v824_v17 = vpop.f32.mrf.mxu0 }
 0x327   :  { %916 = dma.done.wait [#allocation4], 32  }
 0x328   :  { %917 = vsyncadd [#allocation4], 4294967264 }
 0x329   :  { %690 = vsyncpa [#allocation3], 1 }
 0x32a   :  { %691 = vsyncpa [#allocation6], 1 }
 0x32b   :  { %692 = vsyncpa [#allocation4], 1 }

</bundles_post_ra>
